<compile_context>
chip_gen: v7x
topology: tpu7x:2x2x1
jax: 0.10.0
libtpu: 0.0.40
codegen_flags: <defaults>
</compile_context>

<pallas_src>
import math
import numpy as np
import jax
import jax.numpy as jnp
from jax import lax
from jax.experimental import pallas as pl
from jax.experimental.pallas import tpu as pltpu


def _round_up(n, m):
    return ((n + m - 1) // m) * m


# ----------------------------------------------------------------------------
# Pallas kernel 1: masked mean pooling over the subword axis.
#   out[n, :] = sum_{t < cnt[n]} x[n, t, :] / max(cnt[n], 1)
# Mask built in-kernel from per-row counts (no mask input stream).
# ----------------------------------------------------------------------------
def mean_pool_kernel(x_ref, cnt_ref, o_ref):
    x = x_ref[...]                                           # (NB, T, H)
    cnt = cnt_ref[...]                                       # (NB, 1) int32
    t_idx = lax.broadcasted_iota(jnp.int32, x.shape, 1)      # time index per elem
    m = (t_idx < cnt[:, :, None]).astype(x.dtype)            # (NB, T, H)
    s = jnp.sum(x * m, axis=1)                               # (NB, H)
    denom = jnp.maximum(cnt.astype(jnp.float32), 1.0)        # exact divide (parity)
    o_ref[...] = s / denom


def masked_mean_pool(x, counts):
    """x: (N, T, H) f32, counts: (N,) host ints. Returns (N, H) f32."""
    N, T, H = x.shape
    n_pad = _round_up(max(N, 8), 8)
    nb = n_pad if n_pad <= 1024 else 512                     # single grid step when small
    n_pad = _round_up(n_pad, nb)
    if n_pad != N:
        x = jnp.pad(x, ((0, n_pad - N), (0, 0), (0, 0)))
    cnt_np = np.zeros((n_pad, 1), np.int32)
    cnt_np[:N, 0] = np.asarray(counts, np.int32)
    out = pl.pallas_call(
        mean_pool_kernel,
        out_shape=jax.ShapeDtypeStruct((n_pad, H), jnp.float32),
        grid_spec=pltpu.PrefetchScalarGridSpec(
            num_scalar_prefetch=0,
            grid=(n_pad // nb,),
            in_specs=[pl.BlockSpec((nb, T, H), lambda i: (i, 0, 0)),
                      pl.BlockSpec((nb, 1), lambda i: (i, 0))],
            out_specs=pl.BlockSpec((nb, H), lambda i: (i, 0)),
        ),
        compiler_params=pltpu.CompilerParams(
            dimension_semantics=("parallel",)),
    )(x, jnp.asarray(cnt_np))
    return out[:N]


# ----------------------------------------------------------------------------
# Pallas kernel 2: NG independent bidirectional LSTMs in one call.
#   grid = (NG groups, 2 directions, nc time chunks)
#   Gate column order (after host-side reorder): [i | f | o | g].
#   Backward direction: index_map selects chunk nc-1-c, in-chunk index tc-1-s.
# ----------------------------------------------------------------------------
def lstm_kernel(x_ref, len_ref, wih_ref, whh_ref, b_ref,
                out_ref, hfin_ref, h_sc, c_sc, gx_sc):
    d = pl.program_id(1)
    c = pl.program_id(2)
    nc = pl.num_programs(2)
    tc, Bp, I = x_ref.shape
    D = h_sc.shape[-1]
    G = 4 * D

    @pl.when(c == 0)
    def _():
        h_sc[...] = jnp.zeros_like(h_sc)
        c_sc[...] = jnp.zeros_like(c_sc)

    # Hoisted input projection for the whole chunk: one dense MXU matmul,
    # bias folded in once.  Only h @ Whh remains on the serial chain.
    gx = jnp.dot(x_ref[...].reshape(tc * Bp, I), wih_ref[...],
                 preferred_element_type=jnp.float32)          # (tc*Bp, G)
    gx_sc[...] = gx.reshape(tc, Bp, G) + b_ref[...]

    whh = whh_ref[...]                                        # (D, G) bf16, resident
    lens = len_ref[...]                                       # (Bp, 1) int32
    c_sel = (1 - d) * c + d * (nc - 1 - c)                    # data chunk index

    def step(s, carry):
        h, c_state = carry                                    # vreg-carried state
        li = (1 - d) * s + d * (tc - 1 - s)                   # in-chunk time index
        gates = gx_sc[li] + jnp.dot(h.astype(jnp.bfloat16), whh,
                                    preferred_element_type=jnp.float32)
        sig = jax.nn.sigmoid(gates[:, :3 * D])                # one sigmoid: [i|f|o]
        i_g = sig[:, 0 * D:1 * D]
        f_g = sig[:, 1 * D:2 * D]
        o_g = sig[:, 2 * D:3 * D]
        g_g = jnp.tanh(gates[:, 3 * D:4 * D])                 # one tanh: [g]
        c_new = f_g * c_state + i_g * g_g
        h_new = o_g * jnp.tanh(c_new)
        keep = (c_sel * tc + li) < lens                       # (Bp,1), in-register mask
        out_ref[li] = jnp.where(keep, h_new, jnp.zeros_like(h_new))
        return (jnp.where(keep, h_new, h),                    # freeze on padded steps
                jnp.where(keep, c_new, c_state))

    h_fin, c_fin = lax.fori_loop(0, tc, step, (h_sc[...], c_sc[...]), unroll=True)
    h_sc[...] = h_fin                                         # one store per chunk
    c_sc[...] = c_fin

    @pl.when(c == nc - 1)
    def _():
        hfin_ref[...] = h_fin                                 # final state, once


def bilstm_multi(xs, lens_list, params_list, *, tc=None):
    """Run len(xs) independent BiLSTMs in one pallas_call.
    xs[k]: (N_k, T_k, I) f32 batch-first.  Returns [(outputs (N_k,T_k,2D),
    h_n (N_k,2D)=[fwd|bwd]) for each group]."""
    NG = len(xs)
    I = xs[0].shape[-1]
    D = params_list[0]['fwd']['whh'].shape[1]
    G = 4 * D
    Bp = _round_up(max(max(x.shape[0] for x in xs), 8), 8)
    T = max(x.shape[1] for x in xs)
    if tc is None:
        tc = T if T <= 32 else 16                             # whole seq per chunk if short
    Tp = _round_up(T, tc)
    nc = Tp // tc

    x_stack, len_stack = [], []
    for x, lens in zip(xs, lens_list):
        Ni, Ti, _ = x.shape
        xp = jnp.pad(x, ((0, Bp - Ni), (0, Tp - Ti), (0, 0)))
        x_stack.append(jnp.transpose(xp, (1, 0, 2)))          # (Tp, Bp, I)
        ln = np.zeros((Bp, 1), np.int32)
        ln[:Ni, 0] = np.asarray(lens, np.int32)
        len_stack.append(ln)
    x_all = jnp.stack(x_stack, axis=0).astype(jnp.bfloat16)   # (NG, Tp, Bp, I)
    len_all = jnp.asarray(np.stack(len_stack, axis=0))        # (NG, Bp, 1) int32

    def reorder(w):  # PyTorch gate rows [i, f, g, o] -> [i, f, o, g]
        return jnp.concatenate([w[:2 * D], w[3 * D:4 * D], w[2 * D:3 * D]], axis=0)

    wih_all = jnp.stack([jnp.stack([reorder(p[d]['wih']).T for d in ('fwd', 'bwd')])
                         for p in params_list]).astype(jnp.bfloat16)    # (NG,2,I,G)
    whh_all = jnp.stack([jnp.stack([reorder(p[d]['whh']).T for d in ('fwd', 'bwd')])
                         for p in params_list]).astype(jnp.bfloat16)    # (NG,2,D,G)
    b_all = jnp.stack([jnp.stack([reorder((p[d]['bih'] + p[d]['bhh'])[:, None]).T
                                  for d in ('fwd', 'bwd')])
                       for p in params_list])                           # (NG,2,1,G) f32

    def rev(dd, cc):                                          # chunk index per direction
        return (1 - dd) * cc + dd * (nc - 1 - cc)

    out, hfin = pl.pallas_call(
        lstm_kernel,
        out_shape=(jax.ShapeDtypeStruct((NG, 2, Tp, Bp, D), jnp.float32),
                   jax.ShapeDtypeStruct((NG, 2, Bp, D), jnp.float32)),
        grid_spec=pltpu.PrefetchScalarGridSpec(
            num_scalar_prefetch=0,
            grid=(NG, 2, nc),
            in_specs=[
                pl.BlockSpec((None, tc, Bp, I), lambda g, d, c: (g, rev(d, c), 0, 0)),
                pl.BlockSpec((None, Bp, 1), lambda g, d, c: (g, 0, 0)),
                pl.BlockSpec((None, None, I, G), lambda g, d, c: (g, d, 0, 0)),
                pl.BlockSpec((None, None, D, G), lambda g, d, c: (g, d, 0, 0)),
                pl.BlockSpec((None, None, 1, G), lambda g, d, c: (g, d, 0, 0)),
            ],
            out_specs=(
                pl.BlockSpec((None, None, tc, Bp, D),
                             lambda g, d, c: (g, d, rev(d, c), 0, 0)),
                pl.BlockSpec((None, None, Bp, D), lambda g, d, c: (g, d, 0, 0)),
            ),
            scratch_shapes=[pltpu.VMEM((Bp, D), jnp.float32),      # h carry
                            pltpu.VMEM((Bp, D), jnp.float32),      # c carry
                            pltpu.VMEM((tc, Bp, G), jnp.float32)], # hoisted x-proj
        ),
        compiler_params=pltpu.CompilerParams(
            dimension_semantics=("parallel", "parallel", "arbitrary")),
    )(x_all, len_all, wih_all, whh_all, b_all)

    results = []
    for gi, x in enumerate(xs):
        Ni, Ti, _ = x.shape
        # backward outputs were written at forward-time positions already
        o = jnp.concatenate([out[gi, 0], out[gi, 1]], axis=-1)    # (Tp, Bp, 2D)
        o = jnp.transpose(o, (1, 0, 2))[:Ni, :Ti]                 # (Ni, Ti, 2D)
        hn = jnp.concatenate([hfin[gi, 0], hfin[gi, 1]], axis=-1)[:Ni]
        results.append((o, hn))
    return results


# ----------------------------------------------------------------------------
# Glue: masked_select / masked_scatter_ equivalents with static host-side masks
# ----------------------------------------------------------------------------
def lens_to_mask(lens, max_len):
    return np.arange(max_len)[None, :] < np.asarray(lens)[:, None]


def select_by_mask(x, mask_np):
    idx = np.nonzero(mask_np)
    return x[idx]


def scatter_by_mask(target_shape, mask_np, source):
    idx = np.nonzero(mask_np)
    return jnp.zeros(target_shape, jnp.float32).at[idx].set(source)


def subword_aggregation(plm_out, meta):
    """SubwordAggregation.forward (mean pooling).  question/table/column are
    pooled in ONE pallas_call, padded to a common max-subword length."""
    H = plm_out.shape[-1]
    names = ('question', 'table', 'column')
    max_sub = max(meta[f'{n}_subword_mask'].shape[1] for n in names)
    padded, counts, sizes = [], [], []
    for n in names:
        sub_mask = meta[f'{n}_subword_mask']
        old = select_by_mask(plm_out, meta[f'{n}_mask_plm'])       # (n_subwords, H)
        grid = scatter_by_mask(sub_mask.shape + (H,), sub_mask, old)
        padded.append(jnp.pad(grid, ((0, 0), (0, max_sub - sub_mask.shape[1]), (0, 0))))
        counts.append(np.asarray(sub_mask.sum(axis=1), np.int32))
        sizes.append(sub_mask.shape[0])
    pooled = masked_mean_pool(jnp.concatenate(padded, axis=0), np.concatenate(counts))
    outs, off = [], 0
    for n, nw in zip(names, sizes):
        wm = meta[f'{n}_word_mask']
        outs.append(scatter_by_mask(wm.shape + (H,), wm, pooled[off:off + nw]))
        off += nw
    return tuple(outs)


def input_rnn_layer(q, t, c, meta, q_params, s_params):
    """InputRNNLayer.forward (cell='lstm', schema_aggregation='head+tail').
    question_lstm and schema_lstm run in one merged pallas_call."""
    n_tab = t.shape[0]
    t_common = max(t.shape[1], c.shape[1])
    t_p = jnp.pad(t, ((0, 0), (0, t_common - t.shape[1]), (0, 0)))
    c_p = jnp.pad(c, ((0, 0), (0, t_common - c.shape[1]), (0, 0)))
    schema_x = jnp.concatenate([t_p, c_p], axis=0)
    schema_lens = np.concatenate([np.asarray(meta['table_word_lens']),
                                  np.asarray(meta['column_word_lens'])])

    (q_out, _q_hn), (_s_out, schema_hidden) = bilstm_multi(
        [q, schema_x],
        [np.asarray(meta['question_lens']), schema_lens],
        [q_params, s_params])

    q_mask = lens_to_mask(meta['question_lens'], q.shape[1])
    questions = select_by_mask(q_out, q_mask)                      # (sum(q_lens), hidden)
    tables = schema_hidden[:n_tab]                                 # head+tail = [fwd|bwd] h_n
    columns = schema_hidden[n_tab:]

    pieces = []
    q_off = t_off = c_off = 0
    for b in range(len(meta['question_lens'])):
        ql = int(meta['question_lens'][b])
        tl = int(meta['table_lens'][b])
        cl = int(meta['column_lens'][b])
        pieces.append(questions[q_off:q_off + ql]); q_off += ql
        pieces.append(tables[t_off:t_off + tl]);    t_off += tl
        pieces.append(columns[c_off:c_off + cl]);   c_off += cl
    return jnp.concatenate(pieces, axis=0)


def init_lstm_params(key, input_size, D):
    """Bidirectional single-layer LSTM params, PyTorch-style uniform(-k, k)."""
    k = 1.0 / math.sqrt(D)
    keys = jax.random.split(key, 8)
    u = lambda kk, shape: jax.random.uniform(kk, shape, jnp.float32, -k, k)
    params = {}
    for d, tag in enumerate(('fwd', 'bwd')):
        params[tag] = dict(
            wih=u(keys[4 * d + 0], (4 * D, input_size)),
            whh=u(keys[4 * d + 1], (4 * D, D)),
            bih=u(keys[4 * d + 2], (4 * D,)),
            bhh=u(keys[4 * d + 3], (4 * D,)),
        )
    return params


def graph_input_layer_plm_forward(plm_outputs, meta, q_params, s_params):
    question, table, column = subword_aggregation(plm_outputs, meta)
    # dropout p=0.0 -> identity
    return input_rnn_layer(question, table, column, meta, q_params, s_params)


# ----------------------------------------------------------------------------
if __name__ == "__main__":
    key = jax.random.PRNGKey(0)
    k_plm, k_q, k_s = jax.random.split(key, 3)

    B = 2              # batch size
    PH = 128           # PLM (config.hidden_size) stand-in (lane-aligned)
    HIDDEN = 256       # rnn hidden_size (module default) -> per-dir D = 128
    D = HIDDEN // 2
    L = 20             # max PLM subword sequence length

    # --- synthetic batch metadata (host-side, like the PyTorch Batch object) ---
    question_lens = np.array([5, 3])
    question_subword_lens = np.array([1, 2, 1, 1, 1, 2, 1, 1])        # per question word
    table_lens = np.array([2, 2])                                     # tables per example
    table_word_lens = np.array([2, 1, 1, 2])                          # words per table name
    table_subword_lens = np.array([1, 1, 2, 1, 1, 1])                 # per table word
    column_lens = np.array([3, 2])                                    # columns per example
    column_word_lens = np.array([1, 2, 1, 1, 2])                      # words per column name
    column_subword_lens = np.array([1, 1, 1, 2, 1, 1, 1])             # per column word

    question_mask_plm = np.zeros((B, L), bool)
    table_mask_plm = np.zeros((B, L), bool)
    column_mask_plm = np.zeros((B, L), bool)
    # example 0: 6 question / 4 table / 5 column subword positions
    question_mask_plm[0, 1:7] = True
    table_mask_plm[0, 8:12] = True
    column_mask_plm[0, 13:18] = True
    # example 1: 4 question / 3 table / 3 column subword positions
    question_mask_plm[1, 1:5] = True
    table_mask_plm[1, 6:9] = True
    column_mask_plm[1, 10:13] = True

    meta = dict(
        question_lens=question_lens,
        table_lens=table_lens,
        column_lens=column_lens,
        table_word_lens=table_word_lens,
        column_word_lens=column_word_lens,
        question_mask_plm=question_mask_plm,
        table_mask_plm=table_mask_plm,
        column_mask_plm=column_mask_plm,
        question_subword_mask=lens_to_mask(question_subword_lens,
                                           int(question_subword_lens.max())),
        table_subword_mask=lens_to_mask(table_subword_lens,
                                        int(table_subword_lens.max())),
        column_subword_mask=lens_to_mask(column_subword_lens,
                                         int(column_subword_lens.max())),
        question_word_mask=lens_to_mask(question_lens, int(question_lens.max())),
        table_word_mask=lens_to_mask(table_word_lens, int(table_word_lens.max())),
        column_word_mask=lens_to_mask(column_word_lens, int(column_word_lens.max())),
    )

    # PLM (BERT) output stand-in: (B, L, PH)
    plm_outputs = jax.random.normal(k_plm, (B, L, PH), jnp.float32)

    # InputRNNLayer parameters (question_lstm and schema_lstm, share_lstm=False)
    q_params = init_lstm_params(k_q, PH, D)
    s_params = init_lstm_params(k_s, PH, D)

    out = graph_input_layer_plm_forward(plm_outputs, meta, q_params, s_params)
    out = jax.block_until_ready(out)

    total_nodes = int(question_lens.sum() + table_lens.sum() + column_lens.sum())
    assert out.shape == (total_nodes, HIDDEN), out.shape
    assert bool(jnp.all(jnp.isfinite(out)))
    print("KERNEL_OK")
</pallas_src>

<mosaic_0001>
module attributes {stable_mosaic.version = 11 : i64} {
  func.func @mean_pool_kernel(%arg0: i32, %arg1: memref<24x2x128xf32, #tpu.memory_space<vmem>>, %arg2: memref<24x1xi32, #tpu.memory_space<vmem>>, %arg3: memref<24x128xf32, #tpu.memory_space<vmem>>) attributes {dimension_semantics = [#tpu.dimension_semantics<parallel>], iteration_bounds = array<i64: 1>, scalar_prefetch = 0 : i64, scratch_operands = 0 : i64, tpu.core_type = #tpu.core_type<tc>, window_params = [{transform_indices = @transform_0, window_bounds = array<i64: 24, 2, 128>}, {transform_indices = @transform_1, window_bounds = array<i64: 24, 1>}, {transform_indices = @transform_2, window_bounds = array<i64: 24, 128>}]} {
    %c0 = arith.constant 0 : index
    %c0_0 = arith.constant 0 : index
    %c0_1 = arith.constant 0 : index
    %0 = vector.load %arg1[%c0, %c0_0, %c0_1] : memref<24x2x128xf32, #tpu.memory_space<vmem>>, vector<24x2x128xf32>
    %c0_2 = arith.constant 0 : index
    %c0_3 = arith.constant 0 : index
    %1 = vector.load %arg2[%c0_2, %c0_3] : memref<24x1xi32, #tpu.memory_space<vmem>>, vector<24x1xi32>
    %2 = tpu.iota {dimensions = array<i32: 1>} : vector<24x2x128xi32>
    %3 = vector.shape_cast %1 : vector<24x1xi32> to vector<24x1x1xi32>
    %4 = vector.broadcast %3 : vector<24x1x1xi32> to vector<24x2x128xi32>
    %5 = arith.cmpi slt, %2, %4 : vector<24x2x128xi32>
    %6 = arith.extui %5 : vector<24x2x128xi1> to vector<24x2x128xi32>
    %7 = arith.sitofp %6 : vector<24x2x128xi32> to vector<24x2x128xf32>
    %8 = arith.mulf %0, %7 : vector<24x2x128xf32>
    %cst = arith.constant dense<0.000000e+00> : vector<24x128xf32>
    %9 = vector.multi_reduction <add>, %8, %cst [1] : vector<24x2x128xf32> to vector<24x128xf32>
    %10 = arith.sitofp %1 : vector<24x1xi32> to vector<24x1xf32>
    %cst_4 = arith.constant 1.000000e+00 : f32
    %11 = vector.broadcast %cst_4 : f32 to vector<24x1xf32>
    %12 = arith.maximumf %10, %11 : vector<24x1xf32>
    %13 = vector.broadcast %12 : vector<24x1xf32> to vector<24x128xf32>
    %14 = arith.divf %9, %13 : vector<24x128xf32>
    %c0_5 = arith.constant 0 : index
    %c0_6 = arith.constant 0 : index
    %15 = vector.load %arg3[%c0_5, %c0_6] : memref<24x128xf32, #tpu.memory_space<vmem>>, vector<24x128xf32>
    tpu.vector_store %arg3[%c0_5, %c0_6], %14 {strides = array<i32>} : memref<24x128xf32, #tpu.memory_space<vmem>>, vector<24x128xf32>,
    return
  }
  func.func @transform_0(%arg0: i32) -> (i32, i32, i32) {
    %c0_i32 = arith.constant 0 : i32
    %c0_i32_0 = arith.constant 0 : i32
    %c0_i32_1 = arith.constant 0 : i32
    return %arg0, %c0_i32, %c0_i32_0 : i32, i32, i32
  }
  func.func @transform_1(%arg0: i32) -> (i32, i32) {
    %c0_i32 = arith.constant 0 : i32
    %c0_i32_0 = arith.constant 0 : i32
    return %arg0, %c0_i32 : i32, i32
  }
  func.func @transform_2(%arg0: i32) -> (i32, i32) {
    %c0_i32 = arith.constant 0 : i32
    %c0_i32_0 = arith.constant 0 : i32
    return %arg0, %c0_i32 : i32, i32
  }
}

</mosaic_0001>

<bundles_post_ra>
// kernel: tpu_custom_call.1
= control target key start
LH: loop header
LB: loop body
LE: loop exit
PB: predicated region body
PF: predicated region fallthrough
CT: control target
= control target key end

     0   :  { %7 = vsyncpa [#allocation3], 0  ;;  %s1331_s0 = inlined_call_operand.hbm [shape: f32[24,2,128], index: 0, kind: input, shape index: {}]   ;;  %s1332_s1 = inlined_call_operand.vmem [shape: s32[24,1], index: 1, kind: input, shape index: {}]   ;;  %s1333_s2 = inlined_call_operand.hbm [shape: f32[24,128], index: 2, kind: output, shape index: {}]  }
   0x1   :  { %8 = vsyncpa [#allocation4], 0  ;;  %s976_s9 = smov [#allocation2]   ;;  %s928_s13 = scalar_lea.hbm %s1331_s0, 768 }
   0x2   :  { %s14_s10 = sshll.u32 %s976_s9, 4  ;;  %p929_p0 = scmp.ne.s32.totalorder %s1331_s0, %s928_s13  ;;  %s15_s10 = int_to_ptr.vmem [resolvable:$true] %s14_s10 }
   0x3   :  { %p932_p1 = scmp.lt.u32.totalorder %s928_s13, %s1331_s0 }
   0x5   :  { %p934_p2 = pnand %p932_p1, %p929_p0 }
   0x7   :  { %937 = shalt.err (!%p934_p2)
}
   0x8   :  { %s938_s18 = scalar_lea.vmem %s15_s10, 768  ;;  %p943_p4 = scmp.lt.s32.totalorder %s15_s10, %s15_s10 }
   0x9   :  { %p939_p3 = scmp.ne.s32.totalorder %s15_s10, %s938_s18  ;;  %p944_p5 = scmp.lt.s32.totalorder %s938_s18, %s938_s18 }
   0xb   :  { %p945_p6 = por %p944_p5, %p943_p4 }
   0xd   :  { %p946_p7 = pnand %p945_p6, %p939_p3 }
   0xf   :  { %949 = shalt.err (!%p946_p7)
}
  0x10   :  { %s977_s19 = smov 32   ;;  %s978_s20 = smov 2  }
  0x11   :  { %20 = dma.hbm_to_vmem [thread:$0]  %s1331_s0, 768, %s15_s10, [#allocation3], %s977_s19, %s977_s19, %s978_s20  }
  0x12   :  { %972 = dma.done.wait [#allocation3], 768  }
  0x13   :  { %973 = vsyncadd [#allocation3], 4294966528  ;;  %v53_v0 = vlaneseq  ;;  %v979_v1 = vmov 0   ;;  %v980_v2 = vmov 1966171168   ;;  %v1020_v7 = vld [vmem:[%s1332_s1] sm:$0xff] }
  0x14   :  { %875 = vset.pattern.permute.xlu0 %v979_v1  ;;  %v57_v3 = vunpack.c.l.s4 %v980_v2  ;;  %876 = vset.pattern.permute.xlu1 %v979_v1  ;;  %v1025_v8 = vld [vmem:[%s1332_s1 + $0x8] sm:$0xff]  ;;  %v1030_v9 = vld [vmem:[%s1332_s1 + $0x10] sm:$0xff]  ;;  %v55_v34 = vcombine.high %v1020_v7, %v1020_v7  ;;  %v635_v61 = vcvt.s32.f32 %v1020_v7  ;;  %vm466_vm1 = vcmask 1041408   ;;  %s982_s1 = smov [#allocation5]  }
  0x15   :  { %v1012_v4 = vshrl.u32 %v53_v0, 7  ;;  %v104_v37 = vcombine.high %v1025_v8, %v1025_v8  ;;  %v153_v40 = vcombine.high %v1030_v9, %v1030_v9  ;;  %v636_v63 = vcvt.s32.f32 %v1025_v8  ;;  %s830_s28 = sshll.u32 %s982_s1, 4  ;;  %s831_s28 = int_to_ptr.vmem [resolvable:$true] %s830_s28 }
  0x16   :  { %v58_v5 = vunpack.c.0.s8 %v57_v3  ;;  %v638_v0 = vmax.f32 %v635_v61, 1.0  ;;  %v637_v1 = vcvt.s32.f32 %v1030_v9  ;;  %s950_s29 = scalar_lea.vmem %s831_s28, 384  ;;  %p955_p9 = scmp.lt.s32.totalorder %s831_s28, %s831_s28 }
  0x17   :  { %v1035_v11 = vsub.s32 0, %v1012_v4  ;;  %v639_v2 = vmax.f32 %v636_v63, 1.0  ;;  %p951_p8 = scmp.ne.s32.totalorder %s831_s28, %s950_s29  ;;  %p956_p10 = scmp.lt.s32.totalorder %s950_s29, %s950_s29 }
  0x18   :  { %v1015_v6 = vsub.s32 %v58_v5, %v1012_v4  ;;  %v640_v5 = vmax.f32 %v637_v1, 1.0 }
  0x19   :  { %p957_p11 = por %p956_p10, %p955_p9 }
  0x1a   :  { %v62_v10 = vrot.slane %v1020_v7, %v1015_v6  ;;  %v111_v12 = vrot.slane %v1025_v8, %v1015_v6  ;;  %v160_v13 = vrot.slane %v1030_v9, %v1015_v6  ;;  %v69_v39 = vrot.slane %v55_v34, %v1015_v6 }
  0x1b   :  { %v118_v43 = vrot.slane %v104_v37, %v1015_v6  ;;  %v167_v46 = vrot.slane %v153_v40, %v1015_v6  ;;  %p958_p12 = pnand %p957_p11, %p951_p8 }
  0x1c   :  { %v78_v14 = vrot.slane %v62_v10, %v1015_v6  ;;  %v70_v15 = vcombine.high %v62_v10, %v62_v10  ;;  %v127_v16 = vrot.slane %v111_v12, %v1015_v6  ;;  %v168_v17 = vcombine.high %v160_v13, %v160_v13 }
  0x1d   :  { %v176_v21 = vrot.slane %v160_v13, %v1015_v6  ;;  %v119_v25 = vcombine.high %v111_v12, %v111_v12  ;;  %v85_v45 = vrot.slane %v69_v39, %v1015_v6  ;;  %v134_v48 = vrot.slane %v118_v43, %v1015_v6 }
  0x1e   :  { %v205_v18 = vrot.slane %v78_v14, %v1035_v11  ;;  %v100_v19 = vcombine.high %v78_v14, %v78_v14  ;;  %v190_v20 = vrot.slane %v168_v17, %v1015_v6  ;;  %v237_v23 = vrot.slane %v127_v16, %v1035_v11 }
  0x1f   :  { %v92_v24 = vrot.slane %v70_v15, %v1015_v6  ;;  %v198_v27 = vcombine.high %v176_v21, %v176_v21  ;;  %v141_v29 = vrot.slane %v119_v25, %v1015_v6  ;;  %v149_v33 = vcombine.high %v127_v16, %v127_v16 }
  0x20   :  { %299 = vperm.xlu0 %875, %v205_v18   ;;  %v213_v22 = vrot.slane %v100_v19, %v1035_v11  ;;  %v273_v26 = vrot.slane %v190_v20, %v1035_v11  ;;  %v200_v42 = vcombine.high %v190_v20, %v190_v20  ;;  %v269_v44 = vrot.slane %v176_v21, %v1035_v11  ;;  %v26_v19 = vld [vmem:[#allocation2] sm:$0x3] }
  0x21   :  { %v209_v28 = vrot.slane %v92_v24, %v1035_v11  ;;  %v277_v30 = vrot.slane %v198_v27, %v1035_v11  ;;  %v102_v31 = vcombine.high %v92_v24, %v92_v24  ;;  %v241_v32 = vrot.slane %v141_v29, %v1035_v11  ;;  %v34_v27 = vld [vmem:[#allocation2 + $0x10] sm:$0x3] }
  0x22   :  { %305 = vperm.xlu1 %876, %v213_v22   ;;  %v151_v36 = vcombine.high %v141_v29, %v141_v29  ;;  %v245_v38 = vrot.slane %v149_v33, %v1035_v11  ;;  %v281_v47 = vrot.slane %v200_v42, %v1035_v11  ;;  %v71_v49 = vcombine.high %v69_v39, %v69_v39  ;;  %v27_v39 = vld [vmem:[#allocation2 + $0x2] sm:$0x3] }
  0x23   :  { %v217_v35 = vrot.slane %v102_v31, %v1035_v11  ;;  %v221_v50 = vrot.slane %v85_v45, %v1035_v11  ;;  %v183_v51 = vrot.slane %v167_v46, %v1015_v6  ;;  %v120_v52 = vcombine.high %v118_v43, %v118_v43 }
  0x24   :  { %323 = vperm.xlu0 %875, %v237_v23   ;;  %v249_v41 = vrot.slane %v151_v36, %v1035_v11  ;;  %v253_v53 = vrot.slane %v134_v48, %v1035_v11  ;;  %v99_v54 = vrot.slane %v71_v49, %v1015_v6  ;;  %v169_v55 = vcombine.high %v167_v46, %v167_v46  ;;  %v28_v23 = vld [vmem:[#allocation2 + $0x4] sm:$0x3] }
  0x25   :  { %v285_v56 = vrot.slane %v183_v51, %v1035_v11  ;;  %v148_v57 = vrot.slane %v120_v52, %v1015_v6  ;;  %v101_v3 = vcombine.high %v85_v45, %v85_v45  ;;  %v199_v12 = vcombine.high %v183_v51, %v183_v51 }
  0x26   :  { %350 = vperm.xlu1 %876, %v273_v26   ;;  %v225_v58 = vrot.slane %v99_v54, %v1035_v11  ;;  %v197_v59 = vrot.slane %v169_v55, %v1015_v6  ;;  %v150_v6 = vcombine.high %v134_v48, %v134_v48  ;;  %v103_v13 = vcombine.high %v99_v54, %v99_v54 }
  0x27   :  { %v257_v60 = vrot.slane %v148_v57, %v1035_v11  ;;  %v229_v10 = vrot.slane %v101_v3, %v1035_v11  ;;  %v293_v8 = vrot.slane %v199_v12, %v1035_v11  ;;  %v152_v14 = vcombine.high %v148_v57, %v148_v57 }
  0x28   :  { %302 = vperm.xlu0 %875, %v209_v28   ;;  %v289_v62 = vrot.slane %v197_v59, %v1035_v11  ;;  %v261_v7 = vrot.slane %v150_v6, %v1035_v11  ;;  %v233_v9 = vrot.slane %v103_v13, %v1035_v11  ;;  %v201_v15 = vcombine.high %v197_v59, %v197_v59 }
  0x29   :  { %v265_v16 = vrot.slane %v152_v14, %v1035_v11  ;;  %v981_v20 = vmov 0.0  }
  0x2a   :  { %353 = vperm.xlu1 %876, %v277_v30   ;;  %v297_v17 = vrot.slane %v201_v15, %v1035_v11 }
  0x2c   :  { %326 = vperm.xlu0 %875, %v241_v32   ;;  %v43_v32 = vld [vmem:[#allocation2 + $0x22] sm:$0x3] }
  0x2e   :  { %308 = vperm.xlu1 %876, %v217_v35  }
  0x30   :  { %329 = vperm.xlu0 %875, %v245_v38  }
  0x32   :  { %332 = vperm.xlu1 %876, %v249_v41  }
  0x34   :  { %347 = vperm.xlu0 %875, %v269_v44  }
  0x36   :  { %356 = vperm.xlu1 %876, %v281_v47  }
  0x38   :  { %311 = vperm.xlu0 %875, %v221_v50  }
  0x3a   :  { %335 = vperm.xlu1 %876, %v253_v53   ;;  %v44_v53 = vld [vmem:[#allocation2 + $0x24] sm:$0x3] }
  0x3c   :  { %359 = vperm.xlu0 %875, %v285_v56  }
  0x3e   :  { %314 = vperm.xlu1 %876, %v225_v58  }
  0x40   :  { %338 = vperm.xlu0 %875, %v257_v60   ;;  %v35_v60 = vld [vmem:[#allocation2 + $0x12] sm:$0x3] }
  0x42   :  { %362 = vperm.xlu1 %876, %v289_v62  }
  0x44   :  { %643 = vperm.xlu0 %875, %v638_v0  }
  0x46   :  { %647 = vperm.xlu1 %876, %v639_v2  }
  0x48   :  { %651 = vperm.xlu0 %875, %v640_v5   ;;  %v29_v5 = vld [vmem:[#allocation2 + $0x6] sm:$0x3] }
  0x4a   :  { %317 = vperm.xlu1 %876, %v229_v10  }
  0x4c   :  { %341 = vperm.xlu0 %875, %v261_v7  }
  0x4e   :  { %365 = vperm.xlu1 %876, %v293_v8  }
  0x50   :  { %320 = vperm.xlu0 %875, %v233_v9  }
  0x52   :  { %344 = vperm.xlu1 %876, %v265_v16  }
  0x54   :  { %368 = vperm.xlu0 %875, %v297_v17  }
  0x9f   :  { %v300_v18 = vpop.permute.xlu0 %299 }
  0xa0   :  { %vm370_vm0 = vcmp.lt.s32.totalorder %v1012_v4, %v300_v18 }
  0xa1   :  { %v842_v21 = vsel %vm370_vm0, 1.0, %v981_v20  ;;  %v306_v22 = vpop.permute.xlu1 %305 }
  0xa2   :  { %v442_v24 = vmul.f32 %v842_v21, %v26_v19  ;;  %vm372_vm2 = vcmp.lt.s32.totalorder %v1012_v4, %v306_v22 }
  0xa3   :  { %v844_v25 = vsel %vm372_vm2, 1.0, %v981_v20  ;;  %v324_v26 = vpop.permute.xlu0 %323 }
  0xa4   :  { %v467_v11 = vsel %vm466_vm1, %v442_v24, 0.0  ;;  %v444_v28 = vmul.f32 %v844_v25, %v28_v23  ;;  %vm378_vm3 = vcmp.lt.s32.totalorder %v1012_v4, %v324_v26  ;;  %v36_v24 = vld [vmem:[#allocation2 + $0x14] sm:$0x3] }
  0xa5   :  { %v468_v29 = vrot.slane %v467_v11, 4  ;;  %v850_v30 = vsel %vm378_vm3, 1.0, %v981_v20  ;;  %v351_v31 = vpop.permute.xlu1 %350 }
  0xa6   :  { %v481_v33 = vsel %vm466_vm1, %v444_v28, 0.0  ;;  %v450_v34 = vmul.f32 %v850_v30, %v34_v27  ;;  %vm387_vm4 = vcmp.lt.s32.totalorder %v1012_v4, %v351_v31  ;;  %v37_v28 = vld [vmem:[#allocation2 + $0x16] sm:$0x3] }
  0xa7   :  { %v469_v35 = vadd.f32 %v468_v29, %v467_v11  ;;  %v482_v36 = vrot.slane %v481_v33, 4  ;;  %v859_v37 = vsel %vm387_vm4, 1.0, %v981_v20  ;;  %v303_v38 = vpop.permute.xlu0 %302 }
  0xa8   :  { %v523_v40 = vsel %vm466_vm1, %v450_v34, 0.0  ;;  %v459_v41 = vmul.f32 %v859_v37, %v43_v32  ;;  %vm371_vm5 = vcmp.lt.s32.totalorder %v1012_v4, %v303_v38 }
  0xa9   :  { %v470_v42 = vrot.slane %v469_v35, 2  ;;  %v483_v43 = vadd.f32 %v482_v36, %v481_v33  ;;  %v524_v44 = vrot.slane %v523_v40, 4  ;;  %v843_v45 = vsel %vm371_vm5, 1.0, %v981_v20  ;;  %v354_v46 = vpop.permute.xlu1 %353 }
  0xaa   :  { %v586_v47 = vsel %vm466_vm1, %v459_v41, 0.0  ;;  %v443_v48 = vmul.f32 %v843_v45, %v27_v39  ;;  %vm388_vm6 = vcmp.lt.s32.totalorder %v1012_v4, %v354_v46  ;;  %v42_v41 = vld [vmem:[#allocation2 + $0x20] sm:$0x3] }
  0xab   :  { %v471_v49 = vadd.f32 %v470_v42, %v469_v35  ;;  %v484_v50 = vrot.slane %v483_v43, 2  ;;  %v525_v51 = vadd.f32 %v524_v44, %v523_v40  ;;  %v587_v52 = vrot.slane %v586_v47, 4  ;;  %v327_v54 = vpop.permute.xlu0 %326 }
  0xac   :  { %v474_v55 = vsel %vm466_vm1, %v443_v48, 0.0  ;;  %v860_v56 = vsel %vm388_vm6, 1.0, %v981_v20  ;;  %vm379_vm7 = vcmp.lt.s32.totalorder %v1012_v4, %v327_v54 }
  0xad   :  { %v472_v57 = vrot.slane %v471_v49, 1  ;;  %v526_v58 = vrot.slane %v525_v51, 2  ;;  %v588_v59 = vadd.f32 %v587_v52, %v586_v47  ;;  %v309_v61 = vpop.permute.xlu1 %308  ;;  %v475_v62 = vrot.slane %v474_v55, 4 }
  0xae   :  { %v460_v63 = vmul.f32 %v860_v56, %v44_v53  ;;  %v851_v0 = vsel %vm379_vm7, 1.0, %v981_v20  ;;  %vm373_vm8 = vcmp.lt.s32.totalorder %v1012_v4, %v309_v61  ;;  %v485_v1 = vadd.f32 %v484_v50, %v483_v43  ;;  %v45_v50 = vld [vmem:[#allocation2 + $0x26] sm:$0x3] }
  0xaf   :  { %v527_v2 = vadd.f32 %v526_v58, %v525_v51  ;;  %v589_v3 = vrot.slane %v588_v59, 2  ;;  %v330_v6 = vpop.permute.xlu0 %329  ;;  %v476_v10 = vadd.f32 %v475_v62, %v474_v55  ;;  %v451_v7 = vmul.f32 %v851_v0, %v35_v60 }
  0xb0   :  { %v593_v12 = vsel %vm466_vm1, %v460_v63, 0.0  ;;  %v845_v13 = vsel %vm373_vm8, 1.0, %v981_v20  ;;  %v1111_v8 = vadd.f32 %v472_v57, %v471_v49  ;;  %vm380_vm9 = vcmp.lt.s32.totalorder %v1012_v4, %v330_v6 }
  0xb1   :  { %v590_v14 = vadd.f32 %v589_v3, %v588_v59  ;;  %v594_v9 = vrot.slane %v593_v12, 4  ;;  %v333_v15 = vpop.permute.xlu1 %332  ;;  %v477_v16 = vrot.slane %v476_v10, 2  ;;  %v530_v17 = vsel %vm466_vm1, %v451_v7, 0.0  ;;  %v30_v59 = vld [vmem:[#allocation2 + $0x8] sm:$0x3] }
  0xb2   :  { %v445_v18 = vmul.f32 %v845_v13, %v29_v5  ;;  %v486_v19 = vrot.slane %v485_v1, 1  ;;  %v528_v21 = vrot.slane %v527_v2, 1  ;;  %v531_v23 = vrot.slane %v530_v17, 4 }
  0xb3   :  { %v595_v22 = vadd.f32 %v594_v9, %v593_v12  ;;  %v348_v25 = vpop.permute.xlu0 %347  ;;  %v478_v26 = vadd.f32 %v477_v16, %v476_v10  ;;  %v852_v11 = vsel %vm380_vm9, 1.0, %v981_v20  ;;  %vm381_vm10 = vcmp.lt.s32.totalorder %v1012_v4, %v333_v15  ;;  %v38_v16 = vld [vmem:[#allocation2 + $0x18] sm:$0x3] }
  0xb4   :  { %v488_v27 = vsel %vm466_vm1, %v445_v18, 0.0  ;;  %v591_v29 = vrot.slane %v590_v14, 1  ;;  %v532_v31 = vadd.f32 %v531_v23, %v530_v17  ;;  %v452_v35 = vmul.f32 %v852_v11, %v36_v24 }
  0xb5   :  { %v596_v30 = vrot.slane %v595_v22, 2  ;;  %v489_v32 = vrot.slane %v488_v27, 4  ;;  %v357_v33 = vpop.permute.xlu1 %356  ;;  %v479_v34 = vrot.slane %v478_v26, 1  ;;  %v853_v36 = vsel %vm381_vm10, 1.0, %v981_v20 }
  0xb6   :  { %vm386_vm11 = vcmp.lt.s32.totalorder %v1012_v4, %v348_v25  ;;  %v533_v38 = vrot.slane %v532_v31, 2  ;;  %v453_v40 = vmul.f32 %v853_v36, %v37_v28  ;;  %v1120_v43 = vadd.f32 %v486_v19, %v485_v1 }
  0xb7   :  { %v597_v37 = vadd.f32 %v596_v30, %v595_v22  ;;  %v490_v39 = vadd.f32 %v489_v32, %v488_v27  ;;  %v312_v42 = vpop.permute.xlu0 %311  ;;  %v537_v44 = vsel %vm466_vm1, %v452_v35, 0.0  ;;  %v858_v45 = vsel %vm386_vm11, 1.0, %v981_v20 }
  0xb8   :  { %vm389_vm12 = vcmp.lt.s32.totalorder %v1012_v4, %v357_v33  ;;  %v1125_v46 = vadd.f32 %v528_v21, %v527_v2  ;;  %v538_v49 = vrot.slane %v537_v44, 4  ;;  %v544_v52 = vsel %vm466_vm1, %v453_v40, 0.0 }
  0xb9   :  { %v598_v47 = vrot.slane %v597_v37, 1  ;;  %v491_v48 = vrot.slane %v490_v39, 2  ;;  %v336_v51 = vpop.permute.xlu1 %335  ;;  %v458_v53 = vmul.f32 %v858_v45, %v42_v41  ;;  %v861_v54 = vsel %vm389_vm12, 1.0, %v981_v20 }
  0xba   :  { %vm374_vm13 = vcmp.lt.s32.totalorder %v1012_v4, %v312_v42  ;;  %v1130_v55 = vadd.f32 %v591_v29, %v590_v14  ;;  %v1132_v56 = vadd.f32 %v479_v34, %v478_v26  ;;  %v534_v57 = vadd.f32 %v533_v38, %v532_v31  ;;  %v46_v26 = vld [vmem:[#allocation2 + $0x28] sm:$0x3]  ;;  %v31_v34 = vld [vmem:[#allocation2 + $0xa] sm:$0x3] }
  0xbb   :  { %v539_v58 = vadd.f32 %v538_v49, %v537_v44  ;;  %v360_v60 = vpop.permute.xlu0 %359  ;;  %v545_v61 = vrot.slane %v544_v52, 4  ;;  %v579_v62 = vsel %vm466_vm1, %v458_v53, 0.0  ;;  %v461_v63 = vmul.f32 %v861_v54, %v45_v50  ;;  %v39_v53 = vld [vmem:[#allocation2 + $0x1a] sm:$0x3] }
  0xbc   :  { %v846_v0 = vsel %vm374_vm13, 1.0, %v981_v20  ;;  %v1136_v1 = vadd.f32 %v598_v47, %v597_v37  ;;  %v492_v2 = vadd.f32 %v491_v48, %v490_v39  ;;  %v580_v5 = vrot.slane %v579_v62, 4 }
  0xbd   :  { %v540_v3 = vrot.slane %v539_v58, 2  ;;  %v315_v6 = vpop.permute.xlu1 %314  ;;  %v546_v10 = vadd.f32 %v545_v61, %v544_v52  ;;  %v600_v12 = vsel %vm466_vm1, %v461_v63, 0.0  ;;  %v446_v7 = vmul.f32 %v846_v0, %v30_v59 }
  0xbe   :  { %vm382_vm14 = vcmp.lt.s32.totalorder %v1012_v4, %v336_v51  ;;  %v535_v13 = vrot.slane %v534_v57, 1  ;;  %v581_v9 = vadd.f32 %v580_v5, %v579_v62  ;;  %v601_v15 = vrot.slane %v600_v12, 4 }
  0xbf   :  { %v541_v14 = vadd.f32 %v540_v3, %v539_v58  ;;  %v547_v17 = vrot.slane %v546_v10, 2  ;;  %v495_v18 = vsel %vm466_vm1, %v446_v7, 0.0  ;;  %v854_v19 = vsel %vm382_vm14, 1.0, %v981_v20  ;;  %v339_v21 = vpop.permute.xlu0 %338 }
  0xc0   :  { %vm390_vm15 = vcmp.lt.s32.totalorder %v1012_v4, %v360_v60  ;;  %v493_v22 = vrot.slane %v492_v2, 1  ;;  %v582_v23 = vrot.slane %v581_v9, 2  ;;  %v602_v24 = vadd.f32 %v601_v15, %v600_v12  ;;  %v47_v60 = vld [vmem:[#allocation2 + $0x2a] sm:$0x3] }
  0xc1   :  { %v496_v25 = vrot.slane %v495_v18, 4  ;;  %v363_v27 = vpop.permute.xlu1 %362  ;;  %v548_v11 = vadd.f32 %v547_v17, %v546_v10  ;;  %v454_v28 = vmul.f32 %v854_v19, %v38_v16  ;;  %v862_v29 = vsel %vm390_vm15, 1.0, %v981_v20 }
  0xc2   :  { %vm375_vm0 = vcmp.lt.s32.totalorder %v1012_v4, %v315_v6  ;;  %v1145_v30 = vadd.f32 %v535_v13, %v534_v57  ;;  %v583_v31 = vadd.f32 %v582_v23, %v581_v9  ;;  %v603_v32 = vrot.slane %v602_v24, 2 }
  0xc3   :  { %v497_v33 = vadd.f32 %v496_v25, %v495_v18  ;;  %v542_v35 = vrot.slane %v541_v14, 1  ;;  %v551_v36 = vsel %vm466_vm1, %v454_v28, 0.0  ;;  %v462_v37 = vmul.f32 %v862_v29, %v46_v26  ;;  %v1153_v48 = vpop.permute.xlu0 %643 }
  0xc4   :  { %v847_v38 = vsel %vm375_vm0, 1.0, %v981_v20  ;;  %v549_v39 = vrot.slane %v548_v11, 1  ;;  %v604_v40 = vadd.f32 %v603_v32, %v602_v24  ;;  %v552_v42 = vrot.slane %v551_v36, 4 }
  0xc5   :  { %v498_v41 = vrot.slane %v497_v33, 2  ;;  %v1149_v44 = vadd.f32 %v493_v22, %v492_v2  ;;  %v607_v45 = vsel %vm466_vm1, %v462_v37, 0.0  ;;  %v447_v47 = vmul.f32 %v847_v38, %v31_v34  ;;  %v1155_v54 = vpop.permute.xlu1 %647 }
  0xc6   :  { %vm383_vm2 = vcmp.lt.s32.totalorder %v1012_v4, %v339_v21  ;;  %v584_v49 = vrot.slane %v583_v31, 1  ;;  %v605_v50 = vrot.slane %v604_v40, 1  ;;  %v553_v52 = vadd.f32 %v552_v42, %v551_v36 }
  0xc7   :  { %v499_v51 = vadd.f32 %v498_v41, %v497_v33  ;;  %v608_v57 = vrot.slane %v607_v45, 4  ;;  %v502_v58 = vsel %vm466_vm1, %v447_v47, 0.0  ;;  %v855_v59 = vsel %vm383_vm2, 1.0, %v981_v20  ;;  %v1171_v17 = vpop.permute.xlu0 %651 }
  0xc8   :  { %vm391_vm3 = vcmp.lt.s32.totalorder %v1012_v4, %v363_v27  ;;  %v1160_v61 = vadd.f32 %v542_v35, %v541_v14  ;;  %v1162_v62 = vadd.f32 %v549_v39, %v548_v11  ;;  %v554_v63 = vrot.slane %v553_v52, 2 }
  0xc9   :  { %v503_v0 = vrot.slane %v502_v58, 4  ;;  %v500_v2 = vrot.slane %v499_v51, 1  ;;  %v609_v3 = vadd.f32 %v608_v57, %v607_v45  ;;  %v455_v5 = vmul.f32 %v855_v59, %v39_v53  ;;  %v318_v23 = vpop.permute.xlu1 %317 }
  0xca   :  { %v863_v6 = vsel %vm391_vm3, 1.0, %v981_v20  ;;  %v1165_v10 = vadd.f32 %v584_v49, %v583_v31  ;;  %v555_v12 = vadd.f32 %v554_v63, %v553_v52  ;;  %v1167_v9 = vadd.f32 %v605_v50, %v604_v40 }
  0xcb   :  { %v504_v7 = vadd.f32 %v503_v0, %v502_v58  ;;  %v463_v13 = vmul.f32 %v863_v6, %v47_v60  ;;  %v610_v15 = vrot.slane %v609_v3, 2  ;;  %v558_v14 = vsel %vm466_vm1, %v455_v5, 0.0  ;;  %v342_v41 = vpop.permute.xlu0 %341 }
  0xcc   :  { %v653_v16 = vrot.slane %v1153_v48, 1  ;;  %v556_v18 = vrot.slane %v555_v12, 1  ;;  %v559_v21 = vrot.slane %v558_v14, 4  ;;  %v1174_v24 = vadd.f32 %v500_v2, %v499_v51 }
  0xcd   :  { %v505_v19 = vrot.slane %v504_v7, 2  ;;  %v614_v22 = vsel %vm466_vm1, %v463_v13, 0.0  ;;  %v611_v25 = vadd.f32 %v610_v15, %v609_v3  ;;  %v654_v27 = vrot.slane %v1153_v48, 2  ;;  %v366_v49 = vpop.permute.xlu1 %365  ;;  %v32_v3 = vld [vmem:[#allocation2 + $0xc] sm:$0x3] }
  0xce   :  { %v615_v26 = vrot.slane %v614_v22, 4  ;;  %v560_v28 = vadd.f32 %v559_v21, %v558_v14  ;;  %v655_v29 = vrot.slane %v1153_v48, 3  ;;  %v656_v31 = vrot.slane %v1153_v48, 4  ;;  %v48_v14 = vld [vmem:[#allocation2 + $0x2c] sm:$0x3] }
  0xcf   :  { %v506_v11 = vadd.f32 %v505_v19, %v504_v7  ;;  %v612_v32 = vrot.slane %v611_v25, 1  ;;  %v657_v34 = vrot.slane %v1153_v48, 5  ;;  %880 = vrcp.f32 %v1153_v48  ;;  %v40_v7 = vld [vmem:[#allocation2 + $0x1c] sm:$0x3]  ;;  %v321_v13 = vpop.permute.xlu0 %320 }
  0xd0   :  { %v616_v33 = vadd.f32 %v615_v26, %v614_v22  ;;  %v1181_v35 = vadd.f32 %v556_v18, %v555_v12  ;;  %v561_v37 = vrot.slane %v560_v28, 2  ;;  %882 = vrcp.f32 %v653_v16 }
  0xd1   :  { %v507_v36 = vrot.slane %v506_v11, 1  ;;  %v658_v39 = vrot.slane %v1153_v48, 6  ;;  %v659_v40 = vrot.slane %v1153_v48, 7  ;;  %884 = vrcp.f32 %v654_v27  ;;  %v345_v16 = vpop.permute.xlu1 %344 }
  0xd2   :  { %v617_v38 = vrot.slane %v616_v33, 2  ;;  %v1185_v42 = vadd.f32 %v612_v32, %v611_v25  ;;  %v1187_v45 = vadd.f32 %v561_v37, %v560_v28  ;;  %886 = vrcp.f32 %v655_v29  ;;  %v33_v29 = vld [vmem:[#allocation2 + $0xe] sm:$0x3] }
  0xd3   :  { %v660_v47 = vrot.slane %v1155_v54, 1  ;;  %v1190_v50 = vadd.f32 %v507_v36, %v506_v11  ;;  %888 = vrcp.f32 %v656_v31  ;;  %v661_v52 = vrot.slane %v1155_v54, 2  ;;  %v41_v36 = vld [vmem:[#allocation2 + $0x1e] sm:$0x3] }
  0xd4   :  { %v1192_v51 = vadd.f32 %v617_v38, %v616_v33  ;;  %890 = vrcp.f32 %v657_v34  ;;  %v662_v48 = vrot.slane %v1155_v54, 3  ;;  %v663_v53 = vrot.slane %v1155_v54, 4 }
  0xd5   :  { %v664_v57 = vrot.slane %v1155_v54, 5  ;;  %v563_v58 = vrot.slane %v1187_v45, 1  ;;  %892 = vrcp.f32 %v658_v39  ;;  %v665_v59 = vrot.slane %v1155_v54, 6 }
  0xd6   :  { %v666_v60 = vrot.slane %v1155_v54, 7  ;;  %v619_v63 = vrot.slane %v1192_v51, 1  ;;  %894 = vrcp.f32 %v659_v40  ;;  %v667_v0 = vrot.slane %v1171_v17, 1 }
  0xd7   :  { %v668_v2 = vrot.slane %v1171_v17, 2  ;;  %896 = vrcp.f32 %v1155_v54  ;;  %v669_v5 = vrot.slane %v1171_v17, 3  ;;  %v670_v6 = vrot.slane %v1171_v17, 4 }
  0xd8   :  { %v671_v12 = vrot.slane %v1171_v17, 5  ;;  %898 = vrcp.f32 %v660_v47  ;;  %v672_v15 = vrot.slane %v1171_v17, 6  ;;  %vm376_vm4 = vcmp.lt.s32.totalorder %v1012_v4, %v318_v23 }
  0xd9   :  { %vm384_vm5 = vcmp.lt.s32.totalorder %v1012_v4, %v342_v41  ;;  %v1211_v18 = vpop.eup %880  ;;  %v673_v19 = vrot.slane %v1171_v17, 7  ;;  %v848_v21 = vsel %vm376_vm4, 1.0, %v981_v20  ;;  %vm392_vm6 = vcmp.lt.s32.totalorder %v1012_v4, %v366_v49  ;;  %v369_v41 = vpop.permute.xlu0 %368 }
  0xda   :  { %v856_v22 = vsel %vm384_vm5, 1.0, %v981_v20  ;;  %v1217_v25 = vpop.eup %882  ;;  %900 = vrcp.f32 %v661_v52  ;;  %v448_v26 = vmul.f32 %v848_v21, %v32_v3  ;;  %v864_v23 = vsel %vm392_vm6, 1.0, %v981_v20 }
  0xdb   :  { %v456_v27 = vmul.f32 %v856_v22, %v40_v7  ;;  %v1220_v11 = vpop.eup %884  ;;  %902 = vrcp.f32 %v662_v48  ;;  %v464_v28 = vmul.f32 %v864_v23, %v48_v14  ;;  %vm377_vm7 = vcmp.lt.s32.totalorder %v1012_v4, %v321_v13 }
  0xdc   :  { %vm385_vm8 = vcmp.lt.s32.totalorder %v1012_v4, %v345_v16  ;;  %v1224_v31 = vpop.eup %886  ;;  %904 = vrcp.f32 %v663_v53  ;;  %v509_v32 = vsel %vm466_vm1, %v448_v26, 0.0  ;;  %v849_v34 = vsel %vm377_vm7, 1.0, %v981_v20 }
  0xdd   :  { %v565_v33 = vsel %vm466_vm1, %v456_v27, 0.0  ;;  %v1229_v37 = vpop.eup %888  ;;  %906 = vrcp.f32 %v664_v57  ;;  %v510_v38 = vrot.slane %v509_v32, 4  ;;  %v621_v40 = vsel %vm466_vm1, %v464_v28, 0.0  ;;  %v49_v27 = vld [vmem:[#allocation2 + $0x2e] sm:$0x3] }
  0xde   :  { %v566_v39 = vrot.slane %v565_v33, 4  ;;  %v1232_v47 = vpop.eup %890  ;;  %908 = vrcp.f32 %v665_v59  ;;  %v622_v49 = vrot.slane %v621_v40, 4  ;;  %v449_v52 = vmul.f32 %v849_v34, %v33_v29 }
  0xdf   :  { %v857_v48 = vsel %vm385_vm8, 1.0, %v981_v20  ;;  %v893_v53 = vpop.eup %892  ;;  %910 = vrcp.f32 %v1171_v17  ;;  %v511_v3 = vadd.f32 %v510_v38, %v509_v32  ;;  %vm393_vm9 = vcmp.lt.s32.totalorder %v1012_v4, %v369_v41 }
  0xe0   :  { %v567_v7 = vadd.f32 %v566_v39, %v565_v33  ;;  %v457_v57 = vmul.f32 %v857_v48, %v41_v36  ;;  %v1238_v13 = vpop.eup %894  ;;  %912 = vrcp.f32 %v667_v0  ;;  %v623_v14 = vadd.f32 %v622_v49, %v621_v40 }
  0xe1   :  { %v516_v21 = vsel %vm466_vm1, %v449_v52, 0.0  ;;  %v1242_v59 = vpop.eup %896  ;;  %914 = vrcp.f32 %v668_v2  ;;  %v512_v22 = vrot.slane %v511_v3, 2  ;;  %v865_v0 = vsel %vm393_vm9, 1.0, %v981_v20 }
  0xe2   :  { %v568_v16 = vrot.slane %v567_v7, 2  ;;  %v517_v26 = vrot.slane %v516_v21, 4  ;;  %v1244_v23 = vpop.eup %898  ;;  %916 = vrcp.f32 %v669_v5  ;;  %v624_v28 = vrot.slane %v623_v14, 2 }
  0xe3   :  { %v572_v29 = vsel %vm466_vm1, %v457_v57, 0.0  ;;  %918 = vrcp.f32 %v670_v6  ;;  %v513_v32 = vadd.f32 %v512_v22, %v511_v3  ;;  %v465_v38 = vmul.f32 %v865_v0, %v49_v27 }
  0xe4   :  { %v569_v4 = vadd.f32 %v568_v16, %v567_v7  ;;  %v518_v33 = vadd.f32 %v517_v26, %v516_v21  ;;  %v901_v34 = vpop.eup %900  ;;  %920 = vrcp.f32 %v671_v12  ;;  %v625_v2 = vadd.f32 %v624_v28, %v623_v14 }
  0xe5   :  { %v573_v36 = vrot.slane %v572_v29, 4  ;;  %v903_v39 = vpop.eup %902  ;;  %922 = vrcp.f32 %v672_v15  ;;  %v514_v5 = vrot.slane %v513_v32, 1  ;;  %v628_v52 = vsel %vm466_vm1, %v465_v38, 0.0 }
  0xe6   :  { %v570_v40 = vrot.slane %v569_v4, 1  ;;  %v519_v20 = vrot.slane %v518_v33, 2  ;;  %v905_v41 = vpop.eup %904  ;;  %924 = vrcp.f32 %v666_v60  ;;  %v626_v6 = vrot.slane %v625_v2, 1 }
  0xe7   :  { %v574_v49 = vadd.f32 %v573_v36, %v572_v29  ;;  %v907_v48 = vpop.eup %906  ;;  %v515_v12 = vadd.f32 %v514_v5, %v513_v32  ;;  %v629_v57 = vrot.slane %v628_v52, 4  ;;  %v564_v15 = vadd.f32 %v563_v58, %v1187_v45 }
  0xe8   :  { %v571_v3 = vadd.f32 %v570_v40, %v569_v4  ;;  %v520_v7 = vadd.f32 %v519_v20, %v518_v33  ;;  %v909_v14 = vpop.eup %908  ;;  %v620_v21 = vadd.f32 %v619_v63, %v1192_v51  ;;  %926 = vrcp.f32 %v673_v19 }
  0xe9   :  { %v575_v54 = vrot.slane %v574_v49, 2  ;;  %vm771_vm10 = vcmask 1041409   ;;  %v911_v60 = vpop.eup %910  ;;  %v1265_v22 = vmul.f32 %v893_v53, %v515_v12  ;;  %v630_v27 = vadd.f32 %v629_v57, %v628_v52 }
  0xea   :  { %v1267_v16 = vmul.f32 %v909_v14, %v571_v3  ;;  %v521_v26 = vrot.slane %v520_v7, 1  ;;  %vm774_vm1 = vcmask 1042434   ;;  %v913_v28 = vpop.eup %912  ;;  %v627_v29 = vadd.f32 %v626_v6, %v625_v2 }
  0xeb   :  { %v576_v45 = vadd.f32 %v575_v54, %v574_v49  ;;  %v699_v58 = vmul.f32 %v1211_v18, %v1111_v8  ;;  %v701_v17 = vmul.f32 %v1217_v25, %v1132_v56  ;;  %vm777_vm11 = vcmask 1043459   ;;  %v915_v51 = vpop.eup %914 }
  0xec   :  { %v522_v63 = vadd.f32 %v521_v26, %v520_v7  ;;  %v631_v19 = vrot.slane %v630_v27, 2  ;;  %v703_v53 = vmul.f32 %v1220_v11, %v1120_v43  ;;  %v705_v0 = vmul.f32 %v1224_v31, %v1149_v44  ;;  %v917_v32 = vpop.eup %916 }
  0xed   :  { %vm780_vm12 = vcmask 1044484   ;;  %v785_v4 = vrot.slane %v1265_v22, 2  ;;  %v801_v33 = vrot.slane %v1267_v16, 2  ;;  %v577_v8 = vrot.slane %v576_v45, 1  ;;  %v919_v18 = vpop.eup %918 }
  0xee   :  { %v707_v56 = vmul.f32 %v1229_v37, %v1174_v24  ;;  %vm783_vm13 = vcmask 1045509   ;;  %v713_v25 = vmul.f32 %v1238_v13, %v522_v63  ;;  %v632_v2 = vadd.f32 %v631_v19, %v630_v27  ;;  %v921_v11 = vpop.eup %920 }
  0xef   :  { %v709_v43 = vmul.f32 %v1232_v47, %v1190_v50  ;;  %v715_v44 = vmul.f32 %v1242_v59, %v1125_v46  ;;  %vm786_vm14 = vcmask 1046534   ;;  %v578_v31 = vadd.f32 %v577_v8, %v576_v45  ;;  %v923_v37 = vpop.eup %922 }
  0xf0   :  { %v717_v36 = vmul.f32 %v1244_v23, %v1145_v30  ;;  %v719_v38 = vmul.f32 %v901_v34, %v1160_v61  ;;  %v721_v24 = vmul.f32 %v903_v39, %v1162_v62  ;;  %vm789_vm15 = vcmask 1047559   ;;  %v925_v47 = vpop.eup %924 }
  0xf1   :  { %v633_v13 = vrot.slane %v632_v2, 1  ;;  %v723_v5 = vmul.f32 %v905_v41, %v1181_v35  ;;  %v725_v40 = vmul.f32 %v907_v48, %v564_v15  ;;  %v731_v50 = vmul.f32 %v911_v60, %v1165_v10 }
  0xf2   :  { %v743_v46 = vmul.f32 %v923_v37, %v627_v29  ;;  %v788_v59 = vrot.slane %v713_v25, 1  ;;  %v733_v20 = vmul.f32 %v913_v28, %v1130_v55  ;;  %v735_v6 = vmul.f32 %v915_v51, %v1136_v1  ;;  %v927_v62 = vpop.eup %926 }
  0xf3   :  { %v729_v30 = vmul.f32 %v925_v47, %v578_v31  ;;  %v634_v23 = vadd.f32 %v633_v13, %v632_v2  ;;  %v770_v61 = vrot.slane %v701_v17, 7  ;;  %v773_v34 = vrot.slane %v703_v53, 6 }
  0xf4   :  { %v815_v39 = vrot.slane %v743_v46, 2  ;;  %v737_v49 = vmul.f32 %v917_v32, %v1167_v9  ;;  %v739_v35 = vmul.f32 %v919_v18, %v1185_v42  ;;  %v741_v41 = vmul.f32 %v921_v11, %v620_v21 }
  0xf5   :  { %v772_v10 = vsel %vm771_vm10, %v770_v61, %v699_v58  ;;  %v776_v52 = vrot.slane %v705_v0, 5  ;;  %v779_v48 = vrot.slane %v707_v56, 4  ;;  %v791_v12 = vrot.slane %v717_v36, 7 }
  0xf6   :  { %v745_v3 = vmul.f32 %v927_v62, %v634_v23  ;;  %v775_v55 = vsel %vm774_vm1, %v773_v34, %v772_v10  ;;  %v782_v1 = vrot.slane %v709_v43, 3  ;;  %v793_v7 = vrot.slane %v719_v38, 6 }
  0xf7   :  { %v778_v57 = vsel %vm777_vm11, %v776_v52, %v775_v55  ;;  %v792_v14 = vsel %vm771_vm10, %v791_v12, %v715_v44  ;;  %v795_v15 = vrot.slane %v721_v24, 5  ;;  %v797_v54 = vrot.slane %v723_v5, 4 }
  0xf8   :  { %v781_v9 = vsel %vm780_vm12, %v779_v48, %v778_v57  ;;  %v794_v42 = vsel %vm774_vm1, %v793_v7, %v792_v14  ;;  %v805_v21 = vrot.slane %v733_v20, 7  ;;  %v807_v60 = vrot.slane %v735_v6, 6 }
  0xf9   :  { %v803_v22 = vrot.slane %v729_v30, 1  ;;  %v784_v26 = vsel %vm783_vm13, %v782_v1, %v781_v9  ;;  %v796_v27 = vsel %vm777_vm11, %v795_v15, %v794_v42  ;;  %v799_v28 = vrot.slane %v725_v40, 3 }
  0xfa   :  { %v787_v29 = vsel %vm786_vm14, %v785_v4, %v784_v26  ;;  %v798_v45 = vsel %vm780_vm12, %v797_v54, %v796_v27  ;;  %v806_v58 = vsel %vm771_vm10, %v805_v21, %v731_v50  ;;  %v809_v17 = vrot.slane %v737_v49, 5 }
  0xfb   :  { %v790_v51 = vsel %vm789_vm15, %v788_v59, %v787_v29  ;;  %v800_v63 = vsel %vm783_vm13, %v799_v28, %v798_v45  ;;  %v808_v19 = vsel %vm774_vm1, %v807_v60, %v806_v58  ;;  %v811_v53 = vrot.slane %v739_v35, 4 }
  0xfc   :  { %v817_v0 = vrot.slane %v745_v3, 1  ;;  %v802_v32 = vsel %vm786_vm14, %v801_v33, %v800_v63  ;;  %v810_v8 = vsel %vm777_vm11, %v809_v17, %v808_v19  ;;  %v813_v4 = vrot.slane %v741_v41, 3  ;;  %822 = vst [vmem:[#allocation5] sm:$0xff] %v790_v51 }
  0xfd   :  { %v804_v56 = vsel %vm789_vm15, %v803_v22, %v802_v32  ;;  %v812_v18 = vsel %vm780_vm12, %v811_v53, %v810_v8 }
  0xfe   :  { %v814_v25 = vsel %vm783_vm13, %v813_v4, %v812_v18  ;;  %823 = vst [vmem:[#allocation5 + $0x8] sm:$0xff] %v804_v56 }
  0xff   :  { %v816_v2 = vsel %vm786_vm14, %v815_v39, %v814_v25 }
 0x100   :  { %v818_v16 = vsel %vm789_vm15, %v817_v0, %v816_v2 }
 0x101   :  { %824 = vst [vmem:[#allocation5 + $0x10] sm:$0xff] %v818_v16 }
 0x102   :  { %961 = shalt.err (!%p958_p12)
}
 0x103   :  { %s962_s4 = scalar_lea.hbm %s1333_s2, 384 }
 0x104   :  { %p963_p13 = scmp.ne.s32.totalorder %s1333_s2, %s962_s4  ;;  %p966_p0 = scmp.lt.u32.totalorder %s962_s4, %s1333_s2 }
 0x106   :  { %p968_p1 = pnand %p966_p0, %p963_p13 }
 0x108   :  { %971 = shalt.err (!%p968_p1)
}
 0x109   :  { %s983_s9 = smov 128   ;;  %s984_s10 = smov 8  }
 0x10a   :  { %836 = dma.vmem_to_hbm [thread:$0]  %s831_s28, 384, %s1333_s2, [#allocation4], %s983_s9, %s983_s9, %s984_s10  }
 0x10b   :  { %974 = dma.done.wait [#allocation4], 384  }
 0x10c   :  { %975 = vsyncadd [#allocation4], 4294966912 }
 0x10d   :  { %840 = vsyncpa [#allocation3], 1 }
 0x10e   :  { %841 = vsyncpa [#allocation4], 1 }

</bundles_post_ra>
